<compile_context>
chip_gen: v6e
topology: v6e:2x2x1
jax: 0.10.0
libtpu: 0.0.40
codegen_flags: <defaults>
</compile_context>

<pallas_src>
import functools

import jax
import jax.numpy as jnp
from jax import lax
from jax.experimental import pallas as pl
from jax.experimental.pallas import tpu as pltpu

EPS = 1e-5          # torch.nn.InstanceNorm2d default
NEG_SLOPE = 0.2     # LeakyReLU(0.2)


# -----------------------------------------------------------------------------
# Fused kernel: conv tile (bf16 MXU, f32 acc) + per-channel stats in scratch +
# in-place InstanceNorm/affine/LeakyReLU on the VMEM-resident output slab.
# grid = (N, n_ct, n_pt); output block index constant over pt (resident).
# -----------------------------------------------------------------------------
def _fused_kernel(patches_ref, w_ref, gamma_ref, beta_ref, o_ref,
                  sum_ref, sq_ref, *, inv_p, n_pt, tp):
    pt = pl.program_id(2)

    @pl.when(pt == 0)
    def _init():
        sum_ref[...] = jnp.zeros_like(sum_ref)
        sq_ref[...] = jnp.zeros_like(sq_ref)

    x = patches_ref[0]                                      # (ck, tp)      bf16
    w = w_ref[...]                                          # (c_tile, ck)  bf16
    y = jnp.dot(w, x, preferred_element_type=jnp.float32)   # (c_tile, tp)  f32

    sum_ref[...] += jnp.sum(y, axis=1, keepdims=True)
    sq_ref[...] += jnp.sum(y * y, axis=1, keepdims=True)

    off = pl.multiple_of(pt * tp, 128)
    o_ref[0, :, pl.ds(off, tp)] = y.astype(o_ref.dtype)     # lane-dense, tile-aligned

    @pl.when(pt == n_pt - 1)
    def _finalize():
        mean = sum_ref[...] * inv_p                         # (c_tile, 1)
        var = jnp.maximum(sq_ref[...] * inv_p - mean * mean, 0.0)  # biased variance
        scale = gamma_ref[...] * lax.rsqrt(var + EPS)
        shift = beta_ref[...] - mean * scale

        def _apply(i, carry):
            o2 = pl.multiple_of(i * tp, 128)
            z = o_ref[0, :, pl.ds(o2, tp)].astype(jnp.float32) * scale + shift
            o_ref[0, :, pl.ds(o2, tp)] = jnp.where(
                z > 0, z, NEG_SLOPE * z).astype(o_ref.dtype)
            return carry

        lax.fori_loop(0, n_pt, _apply, 0)


# -----------------------------------------------------------------------------
# Fallback kernel A: conv tile + per-channel stats (stats = resident outputs).
# y intermediate stored as bf16 (halves the intermediate HBM traffic).
# -----------------------------------------------------------------------------
def _conv_stats_kernel(patches_ref, w_ref, y_ref, sum_ref, sq_ref):
    pt = pl.program_id(2)

    @pl.when(pt == 0)
    def _init():
        sum_ref[...] = jnp.zeros_like(sum_ref)
        sq_ref[...] = jnp.zeros_like(sq_ref)

    y = jnp.dot(w_ref[...], patches_ref[0], preferred_element_type=jnp.float32)
    sum_ref[0] += jnp.sum(y, axis=1, keepdims=True)
    sq_ref[0] += jnp.sum(y * y, axis=1, keepdims=True)
    y_ref[0] = y.astype(y_ref.dtype)


# -----------------------------------------------------------------------------
# Fallback kernel B: InstanceNorm (from precomputed f32 stats) + affine + LeakyReLU.
# -----------------------------------------------------------------------------
def _norm_act_kernel(y_ref, sum_ref, sq_ref, gamma_ref, beta_ref, o_ref, *, inv_p):
    y = y_ref[0].astype(jnp.float32)
    mean = sum_ref[0] * inv_p
    var = jnp.maximum(sq_ref[0] * inv_p - mean * mean, 0.0)
    scale = gamma_ref[...] * lax.rsqrt(var + EPS)
    shift = beta_ref[...] - mean * scale
    z = y * scale + shift
    o_ref[0] = jnp.where(z > 0, z, NEG_SLOPE * z).astype(o_ref.dtype)


# -----------------------------------------------------------------------------
# JAX glue
# -----------------------------------------------------------------------------
def _round_up(x, m):
    return (x + m - 1) // m * m


def _pick_div(total, unit, cap):
    """Largest multiple-of-`unit` divisor of `total` (a multiple of unit), <= cap."""
    cap = max(unit, min(cap, total))
    t = (cap // unit) * unit
    while t >= unit:
        if total % t == 0:
            return t
        t -= unit
    return unit


def _vmem_budget_bytes():
    """~3/4 of per-core VMEM; conservative fallback is safe on v7x (64 MiB/TC)."""
    try:
        cap = getattr(pltpu.get_tpu_info(), "vmem_capacity_bytes", 0)
        if cap:
            return int(cap) * 3 // 4
    except Exception:
        pass
    return 48 * 1024 * 1024


def _im2col_ckp(x, k, stride, padding, p_pad):
    """x (N,C,H,W) -> patches (N, C*K*K, p_pad), taps in PyTorch OIHW order.

    Keeps CK on sublanes and spatial P on lanes, padded with zero columns so the
    lane extent is a multiple of 128 (zero columns do not perturb the stats).
    """
    n, c, h, w = x.shape
    h_out = (h + 2 * padding - k) // stride + 1
    w_out = (w + 2 * padding - k) // stride + 1
    xp = jnp.pad(x, ((0, 0), (0, 0), (padding, padding), (padding, padding)))
    cols = []
    for ki in range(k):
        for kj in range(k):
            cols.append(
                xp[:, :, ki:ki + stride * h_out:stride, kj:kj + stride * w_out:stride])
    patches = jnp.stack(cols, axis=2).reshape(n, c * k * k, h_out * w_out)
    if p_pad != h_out * w_out:
        patches = jnp.pad(patches, ((0, 0), (0, 0), (0, p_pad - h_out * w_out)))
    return patches, h_out, w_out


def downsampling_forward(x, weight, gamma, beta, *, kernel_size=4, stride=2,
                         padding=1, max_p_tile=None, force_fallback=False):
    """x: (N, C_in, H, W) NCHW.  weight: (C_out, C_in, K, K).  Returns NCHW."""
    budget = _vmem_budget_bytes()
    return _downsampling_impl(x, weight, gamma, beta, kernel_size, stride, padding,
                              budget, max_p_tile, force_fallback)


@functools.partial(jax.jit, static_argnums=(4, 5, 6, 7, 8, 9))
def _downsampling_impl(x, weight, gamma, beta, kernel_size, stride, padding,
                       vmem_budget, max_p_tile, force_fallback):
    n, c_in, h, w = x.shape
    c_out = weight.shape[0]
    k = kernel_size
    ck = c_in * k * k

    h_out = (h + 2 * padding - k) // stride + 1
    w_out = (w + 2 * padding - k) // stride + 1
    p_dim = h_out * w_out
    p_pad = _round_up(p_dim, 128)

    # bf16 BEFORE im2col so the 16x-expanded patches intermediate is bf16.
    patches, _, _ = _im2col_ckp(x.astype(jnp.bfloat16), k, stride, padding, p_pad)

    # Pad C_out to a multiple of 16 (bf16 sublane packing); padded rows sliced off.
    c_out_pad = _round_up(c_out, 16)
    w_mat = weight.reshape(c_out, ck).astype(jnp.bfloat16)
    gamma_f = gamma.astype(jnp.float32)
    beta_f = beta.astype(jnp.float32)
    if c_out_pad != c_out:
        w_mat = jnp.pad(w_mat, ((0, c_out_pad - c_out), (0, 0)))
        gamma_f = jnp.pad(gamma_f, (0, c_out_pad - c_out), constant_values=1.0)
        beta_f = jnp.pad(beta_f, (0, c_out_pad - c_out))
    gamma2 = gamma_f.reshape(c_out_pad, 1)
    beta2 = beta_f.reshape(c_out_pad, 1)

    out_dtype = x.dtype
    out_bytes = jnp.dtype(out_dtype).itemsize

    # ---- tile selection (generation-adaptive via vmem_budget) -----------------
    # c_out tile: prefer >= 2 tiles so the parallel ct axis feeds both v7x TCs.
    if c_out_pad >= 32:
        c_tile = _pick_div(c_out_pad, 16, min(256, c_out_pad // 2))
    else:
        c_tile = c_out_pad
    n_ct = c_out_pad // c_tile

    fixed = 2 * c_tile * ck * 2                    # weight double buffer (bf16)
    slab = 2 * c_tile * p_pad * out_bytes          # resident output slab (x2 bufs)
    per_tp = 4 * (ck + c_tile)                     # patches + tile bufs, per lane col
    avail_fused = vmem_budget - fixed - slab
    avail_fallback = vmem_budget - fixed

    use_fused = (not force_fallback) and (avail_fused >= per_tp * 128)
    avail = avail_fused if use_fused else avail_fallback
    tp_cap = max(128, avail // per_tp) if avail > 0 else 128
    hard_cap = max_p_tile if max_p_tile is not None else 2048
    tp = _pick_div(p_pad, 128, min(tp_cap, hard_cap))
    n_pt = p_pad // tp
    inv_p = 1.0 / float(p_dim)

    vmem_limit = int(vmem_budget)
    grid = (n, n_ct, n_pt)
    dims3 = ("parallel", "parallel", "arbitrary")

    if use_fused:
        out = pl.pallas_call(
            functools.partial(_fused_kernel, inv_p=inv_p, n_pt=n_pt, tp=tp),
            out_shape=jax.ShapeDtypeStruct((n, c_out_pad, p_pad), out_dtype),
            grid_spec=pltpu.PrefetchScalarGridSpec(
                num_scalar_prefetch=0,
                grid=grid,
                in_specs=[
                    pl.BlockSpec((1, ck, tp), lambda b, ct, pt: (b, 0, pt)),
                    pl.BlockSpec((c_tile, ck), lambda b, ct, pt: (ct, 0)),
                    pl.BlockSpec((c_tile, 1), lambda b, ct, pt: (ct, 0)),
                    pl.BlockSpec((c_tile, 1), lambda b, ct, pt: (ct, 0)),
                ],
                out_specs=pl.BlockSpec((1, c_tile, p_pad),
                                       lambda b, ct, pt: (b, ct, 0)),
                scratch_shapes=[pltpu.VMEM((c_tile, 1), jnp.float32),
                                pltpu.VMEM((c_tile, 1), jnp.float32)],
            ),
            compiler_params=pltpu.CompilerParams(
                dimension_semantics=dims3, vmem_limit_bytes=vmem_limit),
        )(patches, w_mat, gamma2, beta2)
    else:
        y, ssum, ssq = pl.pallas_call(
            _conv_stats_kernel,
            out_shape=(
                jax.ShapeDtypeStruct((n, c_out_pad, p_pad), jnp.bfloat16),
                jax.ShapeDtypeStruct((n, c_out_pad, 1), jnp.float32),
                jax.ShapeDtypeStruct((n, c_out_pad, 1), jnp.float32),
            ),
            grid_spec=pltpu.PrefetchScalarGridSpec(
                num_scalar_prefetch=0,
                grid=grid,
                in_specs=[
                    pl.BlockSpec((1, ck, tp), lambda b, ct, pt: (b, 0, pt)),
                    pl.BlockSpec((c_tile, ck), lambda b, ct, pt: (ct, 0)),
                ],
                out_specs=[
                    pl.BlockSpec((1, c_tile, tp), lambda b, ct, pt: (b, ct, pt)),
                    pl.BlockSpec((1, c_tile, 1), lambda b, ct, pt: (b, ct, 0)),
                    pl.BlockSpec((1, c_tile, 1), lambda b, ct, pt: (b, ct, 0)),
                ],
            ),
            compiler_params=pltpu.CompilerParams(
                dimension_semantics=dims3, vmem_limit_bytes=vmem_limit),
        )(patches, w_mat)

        out = pl.pallas_call(
            functools.partial(_norm_act_kernel, inv_p=inv_p),
            out_shape=jax.ShapeDtypeStruct((n, c_out_pad, p_pad), out_dtype),
            grid_spec=pltpu.PrefetchScalarGridSpec(
                num_scalar_prefetch=0,
                grid=grid,
                in_specs=[
                    pl.BlockSpec((1, c_tile, tp), lambda b, ct, pt: (b, ct, pt)),
                    pl.BlockSpec((1, c_tile, 1), lambda b, ct, pt: (b, ct, 0)),
                    pl.BlockSpec((1, c_tile, 1), lambda b, ct, pt: (b, ct, 0)),
                    pl.BlockSpec((c_tile, 1), lambda b, ct, pt: (ct, 0)),
                    pl.BlockSpec((c_tile, 1), lambda b, ct, pt: (ct, 0)),
                ],
                out_specs=pl.BlockSpec((1, c_tile, tp),
                                       lambda b, ct, pt: (b, ct, pt)),
            ),
            compiler_params=pltpu.CompilerParams(
                dimension_semantics=("parallel", "parallel", "parallel"),
                vmem_limit_bytes=vmem_limit),
        )(y, ssum, ssq, gamma2, beta2)

    # (N, C_out_pad, P_pad) -> (N, C_out, H_out, W_out): slice + free reshape.
    return out[:, :c_out, :p_dim].reshape(n, c_out, h_out, w_out)


# -----------------------------------------------------------------------------
# References
# -----------------------------------------------------------------------------
def _reference_f32(x, weight, gamma, beta, stride=2, padding=1):
    """PyTorch-semantics reference (pure f32 conv)."""
    y = lax.conv_general_dilated(
        x, weight, (stride, stride), ((padding, padding), (padding, padding)),
        dimension_numbers=("NCHW", "OIHW", "NCHW"))
    mean = y.mean(axis=(2, 3), keepdims=True)
    var = y.var(axis=(2, 3), keepdims=True)          # biased, matches InstanceNorm
    z = (y - mean) * lax.rsqrt(var + EPS)
    z = z * gamma.reshape(1, -1, 1, 1) + beta.reshape(1, -1, 1, 1)
    return jnp.where(z > 0, z, NEG_SLOPE * z)


def _reference_bf16(x, weight, gamma, beta, k=4, stride=2, padding=1):
    """Mirror of the kernel math (bf16 MXU operands, f32 accumulation)."""
    n, _, h, w = x.shape
    h_out = (h + 2 * padding - k) // stride + 1
    w_out = (w + 2 * padding - k) // stride + 1
    patches, _, _ = _im2col_ckp(x.astype(jnp.bfloat16), k, stride, padding,
                                h_out * w_out)
    w_mat = weight.reshape(weight.shape[0], -1).astype(jnp.bfloat16)
    y = jnp.einsum("ok,nkp->nop", w_mat, patches, preferred_element_type=jnp.float32)
    mean = y.mean(axis=2, keepdims=True)
    var = ((y - mean) ** 2).mean(axis=2, keepdims=True)
    z = (y - mean) * lax.rsqrt(var + EPS)
    z = z * gamma.reshape(1, -1, 1) + beta.reshape(1, -1, 1)
    z = jnp.where(z > 0, z, NEG_SLOPE * z)
    return z.reshape(n, -1, h_out, w_out)


if __name__ == "__main__":
    key = jax.random.PRNGKey(0)
    kx, kw, kg, kb = jax.random.split(key, 4)

    def run_case(n, c_in, c_out, hw, *, max_p_tile=None, force_fallback=False,
                 mirror_tol=1e-2):
        x = jax.random.normal(kx, (n, c_in, hw, hw), dtype=jnp.float32)
        weight = jax.random.normal(kw, (c_out, c_in, 4, 4), dtype=jnp.float32) * 0.1
        gamma = 1.0 + 0.1 * jax.random.normal(kg, (c_out,), dtype=jnp.float32)
        beta = 0.1 * jax.random.normal(kb, (c_out,), dtype=jnp.float32)

        out = downsampling_forward(x, weight, gamma, beta,
                                   max_p_tile=max_p_tile,
                                   force_fallback=force_fallback)
        out = jax.block_until_ready(out)
        assert out.shape == (n, c_out, hw // 2, hw // 2), out.shape

        err_mirror = float(jnp.abs(out - _reference_bf16(x, weight, gamma, beta)).max())
        assert err_mirror < mirror_tol, ("mirror", err_mirror)
        err_f32 = float(jnp.abs(out - _reference_f32(x, weight, gamma, beta)).max())
        assert err_f32 < 1e-1, ("f32", err_f32)

    # Fused path: P=64 padded to 128 (single tile), C_out 8 padded to 16.
    run_case(2, 4, 8, 16)
    # Fused path with a parallel c_out-tile axis (n_ct=2) and multi-tile P
    # (P=256, tp=128): exercises cross-tile stats and the in-place finalize loop.
    run_case(2, 4, 32, 32, max_p_tile=128)
    # Two-kernel fallback path (bf16 intermediate + separate norm/act pass).
    run_case(2, 4, 32, 32, max_p_tile=128, force_fallback=True, mirror_tol=5e-2)

    print("KERNEL_OK")
</pallas_src>

<mosaic_0001>
module attributes {stable_mosaic.version = 11 : i64} {
  func.func @_fused_kernel(%arg0: i32, %arg1: i32, %arg2: i32, %arg3: memref<1x64x128xbf16, #tpu.memory_space<vmem>>, %arg4: memref<16x64xbf16, #tpu.memory_space<vmem>>, %arg5: memref<16x1xf32, #tpu.memory_space<vmem>>, %arg6: memref<16x1xf32, #tpu.memory_space<vmem>>, %arg7: memref<1x16x128xf32, #tpu.memory_space<vmem>>, %arg8: memref<16x1xf32, #tpu.memory_space<vmem>>, %arg9: memref<16x1xf32, #tpu.memory_space<vmem>>) attributes {dimension_semantics = [#tpu.dimension_semantics<parallel>, #tpu.dimension_semantics<parallel>, #tpu.dimension_semantics<arbitrary>], iteration_bounds = array<i64: 2, 1, 1>, scalar_prefetch = 0 : i64, scratch_operands = 2 : i64, tpu.core_type = #tpu.core_type<tc>, window_params = [{transform_indices = @transform_0, window_bounds = array<i64: 1, 64, 128>}, {transform_indices = @transform_1, window_bounds = array<i64: 16, 64>}, {transform_indices = @transform_2, window_bounds = array<i64: 16, 1>}, {transform_indices = @transform_3, window_bounds = array<i64: 16, 1>}, {transform_indices = @transform_4, window_bounds = array<i64: 1, 16, 128>}]} {
    %c0_i32 = arith.constant 0 : i32
    %0 = arith.cmpi eq, %arg2, %c0_i32 : i32
    %1 = arith.extui %0 : i1 to i32
    %c0_i32_0 = arith.constant 0 : i32
    %2 = arith.cmpi ne, %1, %c0_i32_0 : i32
    scf.if %2 {
      %cst_19 = arith.constant 0.000000e+00 : f32
      %27 = vector.broadcast %cst_19 : f32 to vector<16x1xf32>
      %c0_20 = arith.constant 0 : index
      %c0_21 = arith.constant 0 : index
      %28 = vector.load %arg8[%c0_20, %c0_21] : memref<16x1xf32, #tpu.memory_space<vmem>>, vector<16x1xf32>
      tpu.vector_store %arg8[%c0_20, %c0_21], %27 {strides = array<i32>} : memref<16x1xf32, #tpu.memory_space<vmem>>, vector<16x1xf32>,
      %cst_22 = arith.constant 0.000000e+00 : f32
      %29 = vector.broadcast %cst_22 : f32 to vector<16x1xf32>
      %c0_23 = arith.constant 0 : index
      %c0_24 = arith.constant 0 : index
      %30 = vector.load %arg9[%c0_23, %c0_24] : memref<16x1xf32, #tpu.memory_space<vmem>>, vector<16x1xf32>
      tpu.vector_store %arg9[%c0_23, %c0_24], %29 {strides = array<i32>} : memref<16x1xf32, #tpu.memory_space<vmem>>, vector<16x1xf32>,
    } else {
    }
    %c0 = arith.constant 0 : index
    %c0_1 = arith.constant 0 : index
    %c0_2 = arith.constant 0 : index
    %3 = vector.load %arg3[%c0, %c0_1, %c0_2] : memref<1x64x128xbf16, #tpu.memory_space<vmem>>, vector<1x64x128xbf16>
    %4 = vector.shape_cast %3 : vector<1x64x128xbf16> to vector<64x128xbf16>
    %c0_3 = arith.constant 0 : index
    %c0_4 = arith.constant 0 : index
    %5 = vector.load %arg4[%c0_3, %c0_4] : memref<16x64xbf16, #tpu.memory_space<vmem>>, vector<16x64xbf16>
    %cst = arith.constant dense<0.000000e+00> : vector<16x128xf32>
    %6 = tpu.matmul %5, %4, %cst {dimension_numbers = #tpu.dot_dimension_numbers<[1], [0], [0], [1], [0, 0, 1, 1], [], []>} : vector<16x64xbf16>, vector<64x128xbf16>, vector<16x128xf32> -> vector<16x128xf32>
    %c0_5 = arith.constant 0 : index
    %c0_6 = arith.constant 0 : index
    %7 = vector.load %arg8[%c0_5, %c0_6] : memref<16x1xf32, #tpu.memory_space<vmem>>, vector<16x1xf32>
    %cst_7 = arith.constant dense<0.000000e+00> : vector<16xf32>
    %8 = vector.multi_reduction <add>, %6, %cst_7 [1] : vector<16x128xf32> to vector<16xf32>
    %9 = vector.shape_cast %8 : vector<16xf32> to vector<16x1xf32>
    %10 = arith.addf %7, %9 : vector<16x1xf32>
    %c0_8 = arith.constant 0 : index
    %c0_9 = arith.constant 0 : index
    %11 = vector.load %arg8[%c0_8, %c0_9] : memref<16x1xf32, #tpu.memory_space<vmem>>, vector<16x1xf32>
    tpu.vector_store %arg8[%c0_8, %c0_9], %10 {strides = array<i32>} : memref<16x1xf32, #tpu.memory_space<vmem>>, vector<16x1xf32>,
    %c0_10 = arith.constant 0 : index
    %c0_11 = arith.constant 0 : index
    %12 = vector.load %arg9[%c0_10, %c0_11] : memref<16x1xf32, #tpu.memory_space<vmem>>, vector<16x1xf32>
    %13 = arith.mulf %6, %6 : vector<16x128xf32>
    %cst_12 = arith.constant dense<0.000000e+00> : vector<16xf32>
    %14 = vector.multi_reduction <add>, %13, %cst_12 [1] : vector<16x128xf32> to vector<16xf32>
    %15 = vector.shape_cast %14 : vector<16xf32> to vector<16x1xf32>
    %16 = arith.addf %12, %15 : vector<16x1xf32>
    %c0_13 = arith.constant 0 : index
    %c0_14 = arith.constant 0 : index
    %17 = vector.load %arg9[%c0_13, %c0_14] : memref<16x1xf32, #tpu.memory_space<vmem>>, vector<16x1xf32>
    tpu.vector_store %arg9[%c0_13, %c0_14], %16 {strides = array<i32>} : memref<16x1xf32, #tpu.memory_space<vmem>>, vector<16x1xf32>,
    %c128_i32 = arith.constant 128 : i32
    %18 = arith.muli %arg2, %c128_i32 : i32
    %19 = tpu.assume_multiple %18, 128 : i32
    %c0_15 = arith.constant 0 : index
    %c0_16 = arith.constant 0 : index
    %20 = arith.index_cast %19 : i32 to index
    %21 = vector.load %arg7[%c0_15, %c0_16, %20] : memref<1x16x128xf32, #tpu.memory_space<vmem>>, vector<1x16x128xf32>
    %22 = vector.shape_cast %21 : vector<1x16x128xf32> to vector<16x128xf32>
    %23 = vector.shape_cast %6 : vector<16x128xf32> to vector<1x16x128xf32>
    tpu.vector_store %arg7[%c0_15, %c0_16, %20], %23 {strides = array<i32>} : memref<1x16x128xf32, #tpu.memory_space<vmem>>, vector<1x16x128xf32>,
    %c0_i32_17 = arith.constant 0 : i32
    %24 = arith.cmpi eq, %arg2, %c0_i32_17 : i32
    %25 = arith.extui %24 : i1 to i32
    %c0_i32_18 = arith.constant 0 : i32
    %26 = arith.cmpi ne, %25, %c0_i32_18 : i32
    scf.if %26 {
      %c0_19 = arith.constant 0 : index
      %c0_20 = arith.constant 0 : index
      %27 = vector.load %arg8[%c0_19, %c0_20] : memref<16x1xf32, #tpu.memory_space<vmem>>, vector<16x1xf32>
      %cst_21 = arith.constant 1.562500e-02 : f32
      %28 = vector.broadcast %cst_21 : f32 to vector<16x1xf32>
      %29 = arith.mulf %27, %28 : vector<16x1xf32>
      %c0_22 = arith.constant 0 : index
      %c0_23 = arith.constant 0 : index
      %30 = vector.load %arg9[%c0_22, %c0_23] : memref<16x1xf32, #tpu.memory_space<vmem>>, vector<16x1xf32>
      %cst_24 = arith.constant 1.562500e-02 : f32
      %31 = vector.broadcast %cst_24 : f32 to vector<16x1xf32>
      %32 = arith.mulf %30, %31 : vector<16x1xf32>
      %33 = arith.mulf %29, %29 : vector<16x1xf32>
      %34 = arith.subf %32, %33 : vector<16x1xf32>
      %cst_25 = arith.constant 0.000000e+00 : f32
      %35 = vector.broadcast %cst_25 : f32 to vector<16x1xf32>
      %36 = arith.maximumf %34, %35 : vector<16x1xf32>
      %c0_26 = arith.constant 0 : index
      %c0_27 = arith.constant 0 : index
      %37 = vector.load %arg5[%c0_26, %c0_27] : memref<16x1xf32, #tpu.memory_space<vmem>>, vector<16x1xf32>
      %cst_28 = arith.constant 9.99999974E-6 : f32
      %38 = vector.broadcast %cst_28 : f32 to vector<16x1xf32>
      %39 = arith.addf %36, %38 : vector<16x1xf32>
      %40 = math.rsqrt %39 : vector<16x1xf32>
      %41 = arith.mulf %37, %40 : vector<16x1xf32>
      %c0_29 = arith.constant 0 : index
      %c0_30 = arith.constant 0 : index
      %42 = vector.load %arg6[%c0_29, %c0_30] : memref<16x1xf32, #tpu.memory_space<vmem>>, vector<16x1xf32>
      %43 = arith.mulf %29, %41 : vector<16x1xf32>
      %44 = arith.subf %42, %43 : vector<16x1xf32>
      %c0_i32_31 = arith.constant 0 : i32
      %c128_i32_32 = arith.constant 128 : i32
      %45 = arith.muli %c0_i32_31, %c128_i32_32 : i32
      %46 = tpu.assume_multiple %45, 128 : i32
      %c0_33 = arith.constant 0 : index
      %c0_34 = arith.constant 0 : index
      %47 = arith.index_cast %46 : i32 to index
      %48 = vector.load %arg7[%c0_33, %c0_34, %47] : memref<1x16x128xf32, #tpu.memory_space<vmem>>, vector<1x16x128xf32>
      %49 = vector.shape_cast %48 : vector<1x16x128xf32> to vector<16x128xf32>
      %50 = vector.broadcast %41 : vector<16x1xf32> to vector<16x128xf32>
      %51 = arith.mulf %49, %50 : vector<16x128xf32>
      %52 = vector.broadcast %44 : vector<16x1xf32> to vector<16x128xf32>
      %53 = arith.addf %51, %52 : vector<16x128xf32>
      %cst_35 = arith.constant 0.000000e+00 : f32
      %54 = vector.broadcast %cst_35 : f32 to vector<16x128xf32>
      %55 = arith.cmpf ogt, %53, %54 : vector<16x128xf32>
      %cst_36 = arith.constant 2.000000e-01 : f32
      %56 = vector.broadcast %cst_36 : f32 to vector<16x128xf32>
      %57 = arith.mulf %56, %53 : vector<16x128xf32>
      %58 = arith.select %55, %53, %57 : vector<16x128xi1>, vector<16x128xf32>
      %c0_37 = arith.constant 0 : index
      %c0_38 = arith.constant 0 : index
      %59 = arith.index_cast %46 : i32 to index
      %60 = vector.load %arg7[%c0_37, %c0_38, %59] : memref<1x16x128xf32, #tpu.memory_space<vmem>>, vector<1x16x128xf32>
      %61 = vector.shape_cast %60 : vector<1x16x128xf32> to vector<16x128xf32>
      %62 = vector.shape_cast %58 : vector<16x128xf32> to vector<1x16x128xf32>
      tpu.vector_store %arg7[%c0_37, %c0_38, %59], %62 {strides = array<i32>} : memref<1x16x128xf32, #tpu.memory_space<vmem>>, vector<1x16x128xf32>,
      %c1_i32 = arith.constant 1 : i32
    } else {
    }
    return
  }
  func.func @transform_0(%arg0: i32, %arg1: i32, %arg2: i32) -> (i32, i32, i32) {
    %c0_i32 = arith.constant 0 : i32
    %c0_i32_0 = arith.constant 0 : i32
    return %arg0, %c0_i32, %arg2 : i32, i32, i32
  }
  func.func @transform_1(%arg0: i32, %arg1: i32, %arg2: i32) -> (i32, i32) {
    %c0_i32 = arith.constant 0 : i32
    %c0_i32_0 = arith.constant 0 : i32
    return %arg1, %c0_i32 : i32, i32
  }
  func.func @transform_2(%arg0: i32, %arg1: i32, %arg2: i32) -> (i32, i32) {
    %c0_i32 = arith.constant 0 : i32
    %c0_i32_0 = arith.constant 0 : i32
    return %arg1, %c0_i32 : i32, i32
  }
  func.func @transform_3(%arg0: i32, %arg1: i32, %arg2: i32) -> (i32, i32) {
    %c0_i32 = arith.constant 0 : i32
    %c0_i32_0 = arith.constant 0 : i32
    return %arg1, %c0_i32 : i32, i32
  }
  func.func @transform_4(%arg0: i32, %arg1: i32, %arg2: i32) -> (i32, i32, i32) {
    %c0_i32 = arith.constant 0 : i32
    %c0_i32_0 = arith.constant 0 : i32
    return %arg0, %arg1, %c0_i32 : i32, i32, i32
  }
}

</mosaic_0001>

<bundles_post_ra>
// kernel: _downsampling_impl.1
= control target key start
LH: loop header
LB: loop body
LE: loop exit
PB: predicated region body
PF: predicated region fallthrough
CT: control target
= control target key end

     0   :  { %s758_s15 = smov 0   ;;  %s760_s16 = smov 0   ;;  %s830_s0 = inlined_call_operand.vmem [shape: bf16[2,64,128], index: 0, kind: input, shape index: {}]   ;;  %s831_s1 = inlined_call_operand.vmem [shape: bf16[16,64], index: 1, kind: input, shape index: {}]   ;;  %s832_s2 = inlined_call_operand.vmem [shape: f32[16,1], index: 2, kind: input, shape index: {}]   ;;  %s833_s3 = inlined_call_operand.vmem [shape: f32[16,1], index: 3, kind: input, shape index: {}]   ;;  %s834_s4 = inlined_call_operand.vmem [shape: f32[2,16,128], index: 4, kind: output, shape index: {}]  }
   0x1   :  { %s762_s17 = smov 0  }
   0x2 LB: > { %s33_s18 = sadd.s32 1, %s724_s16  ;;  %p636_p0 = scmp.ge.s32.totalorder %s728_s17, 1  ;;  %s728_s17 = sphi %s762_s17, %s14_s17   ;;  %s724_s16 = sphi %s760_s16, %s836_s16   ;;  %s720_s15 = sphi %s758_s15, %s835_s15  }
   0x3   : > { %p35_p1 = scmp.ge.s32.totalorder %s33_s18, 2  ;;  %p221_p2 = scmp.lt.s32.totalorder %s728_s17, 3 }
   0x5   : > { %s838_s18 = smov (%p35_p1, %s33_s18), 0  ;;  %p222_p3 = pnand %p636_p0, %p221_p2 }
   0x6   : > { %p269_p4 = scmp.lt.s32.totalorder (!%p222_p3), %s720_s15, 1 }
   0x7   : > { %225 = sbr.rel (%p222_p3) target bundleno = 540 (0x21c), region = 36 }
   0xc   : > { %v730_v0 = vmov 0.0   ;;  %vm731_vm0 = vmmov 0   ;;  %s840_s15 = smov (!%p269_p4, %s720_s15), 1  ;;  %v701_v5 = vld [vmem:[%s831_s1] sm:$0xff]   ;;  %vm354_vm1 = vcmask 523264   ;;  %vm310_vm2 = vcmask 7168  }
   0xd   : > { %656 = vmatprep.subr.bf16.mxu0 %v730_v0  ;;  %664 = vmatprep.mubr.msk.bf16.mxu0 %vm731_vm0, %v730_v0  ;;  %s649_s19 = sshll.u32 %s840_s15, 5  ;;  %311 = vst.msk [vmem:[#allocation2] sm:$0xff] %vm310_vm2, %v730_v0  ;;  %312 = vst.msk [vmem:[#allocation2 + $0x8] sm:$0xff] %vm310_vm2, %v730_v0  ;;  %v732_v12 = vmov 0   ;;  %v445_v41 = vld [vmem:[%s832_s2] sm:$0xff]  ;;  %v446_v44 = vld [vmem:[%s832_s2 + $0x8] sm:$0xff] }
   0xe   : > { %s276_s22 = scalar_lea.vmem %s830_s0, %s649_s19  ;;  %313 = vst.msk [vmem:[#allocation3] sm:$0xff] %vm310_vm2, %v730_v0  ;;  %314 = vst.msk [vmem:[#allocation3 + $0x8] sm:$0xff] %vm310_vm2, %v730_v0  ;;  %695 = vset.pattern.permute.xlu0 %v732_v12  ;;  %696 = vset.pattern.permute.xlu1 %v732_v12  ;;  %v453_v48 = vld [vmem:[%s833_s3] sm:$0xff]  ;;  %v454_v51 = vld [vmem:[%s833_s3 + $0x8] sm:$0xff]  ;;  %s650_s7 = sshll.u32 %s840_s15, 4 }
   0xf   : > { %v697_v1 = vld [vmem:[%s276_s22 + $0x18] sm:$0xff]   ;;  %v698_v2 = vld [vmem:[%s276_s22 + $0x10] sm:$0xff]   ;;  %v699_v3 = vld [vmem:[%s276_s22 + $0x8] sm:$0xff]   ;;  %s303_s10 = scalar_lea.vmem %s834_s4, %s650_s7 }
  0x10   : > { %657 = vmatpush3.bf16.msra.mxu0 %v697_v1  ;;  %v700_v4 = vld [vmem:[%s276_s22] sm:$0xff]  }
  0x11   : > { %658 = vmatprep.subr.bf16.mxu0 %v730_v0 }
  0x14   : > { %659 = vmatpush3.bf16.msra.mxu0 %v698_v2  ;;  %v399_v13 = vld [vmem:[#allocation2] sm:$0xff]  ;;  %v400_v18 = vld [vmem:[#allocation2 + $0x8] sm:$0xff] }
  0x15   : > { %660 = vmatprep.subr.bf16.mxu0 %v730_v0  ;;  %v410_v15 = vld [vmem:[#allocation3] sm:$0xff]  ;;  %v411_v21 = vld [vmem:[#allocation3 + $0x8] sm:$0xff] }
  0x18   : > { %661 = vmatpush3.bf16.msra.mxu0 %v699_v3 }
  0x19   : > { %662 = vmatprep.subr.bf16.mxu0 %v730_v0 }
  0x1c   : > { %663 = vmatpush3.bf16.msra.mxu0 %v700_v4 }
  0x1f   : > { %665 = vmatmul.mubr.msk.bf16.vlgmr.msra.gmra.mxu0 %vm354_vm1, %v701_v5 }
  0xdf   : > { %v789_v6 = vpop.f32.mrf.mxu0 }
  0xe0   : > { %401 = vadd.xlane.f32.xlu0 %v789_v6  ;;  %v412_v7 = vmul.f32 %v789_v6, %v789_v6 }
  0xe1   : > { %v666_v8 = vpop.f32.mrf.mxu0 }
  0xe2   : > { %414 = vadd.xlane.f32.xlu1 %v412_v7 }
  0xe3   : > { %v794_v9 = vpop.f32.mrf.mxu0 }
  0xe4   : > { %403 = vadd.xlane.f32.xlu0 %v794_v9  ;;  %v413_v10 = vmul.f32 %v794_v9, %v794_v9 }
  0xe5   : > { %v667_v11 = vpop.f32.mrf.mxu0 }
  0xe6   : > { %416 = vadd.xlane.f32.xlu1 %v413_v10 }
 0x169   : > { %v402_v14 = vpop.xlane.xlu0 %401 }
 0x16a   : > { %v405_v16 = vadd.f32 %v402_v14, %v399_v13 }
 0x16b   : > { %v415_v17 = vpop.xlane.xlu1 %414 }
 0x16c   : > { %408 = vst.msk [vmem:[#allocation2] sm:$0xff] %vm310_vm2, %v405_v16  ;;  %v418_v19 = vadd.f32 %v415_v17, %v410_v15 }
 0x16d   : > { %v404_v20 = vpop.xlane.xlu0 %403 }
 0x16e   : > { %420 = vst.msk [vmem:[#allocation3] sm:$0xff] %vm310_vm2, %v418_v19  ;;  %v406_v22 = vadd.f32 %v404_v20, %v400_v18 }
 0x16f   : > { %v417_v23 = vpop.xlane.xlu1 %416 }
 0x170   : > { %409 = vst.msk [vmem:[#allocation2 + $0x8] sm:$0xff] %vm310_vm2, %v406_v22  ;;  %v419_v24 = vadd.f32 %v417_v23, %v411_v21 }
 0x172   : > { %421 = vst.msk [vmem:[#allocation3 + $0x8] sm:$0xff] %vm310_vm2, %v419_v24 }
 0x173   : > { %v431_v25 = vld [vmem:[#allocation2] sm:$0xff] }
 0x174   : > { %v433_v26 = vmul.f32 0.015625, %v431_v25 }
 0x175   : > { %v435_v27 = vld [vmem:[#allocation3] sm:$0xff] }
 0x176   : > { %v437_v28 = vmul.f32 0.015625, %v435_v27  ;;  %v439_v29 = vmul.f32 %v433_v26, %v433_v26 }
 0x177   : > { %v432_v30 = vld [vmem:[#allocation2 + $0x8] sm:$0xff] }
 0x178   : > { %v441_v31 = vsub.f32 %v437_v28, %v439_v29  ;;  %v434_v32 = vmul.f32 0.015625, %v432_v30 }
 0x179   : > { %v436_v33 = vld [vmem:[#allocation3 + $0x8] sm:$0xff] }
 0x17a   : > { %v443_v34 = vmax.f32 %v441_v31, 0.0  ;;  %v438_v35 = vmul.f32 0.015625, %v436_v33  ;;  %v440_v36 = vmul.f32 %v434_v32, %v434_v32 }
 0x17c   : > { %v447_v37 = vadd.f32 1e-05, %v443_v34  ;;  %v442_v38 = vsub.f32 %v438_v35, %v440_v36 }
 0x17e   : > { %702 = vrsqrt.f32 %v447_v37  ;;  %v444_v39 = vmax.f32 %v442_v38, 0.0 }
 0x180   : > { %v448_v40 = vadd.f32 1e-05, %v444_v39 }
 0x182   : > { %704 = vrsqrt.f32 %v448_v40 }
 0x18b   : > { %v703_v42 = vpop.eup %702 }
 0x18c   : > { %v451_v43 = vmul.f32 %v703_v42, %v445_v41 }
 0x18e   : > { %463 = vperm.xlu0 %695, %v451_v43   ;;  %v455_v47 = vmul.f32 %v451_v43, %v433_v26 }
 0x18f   : > { %v705_v45 = vpop.eup %704 }
 0x190   : > { %v452_v46 = vmul.f32 %v705_v45, %v446_v44  ;;  %v457_v49 = vsub.f32 %v453_v48, %v455_v47 }
 0x192   : > { %468 = vperm.xlu1 %696, %v452_v46   ;;  %v456_v50 = vmul.f32 %v452_v46, %v434_v32 }
 0x194   : > { %v458_v52 = vsub.f32 %v454_v51, %v456_v50 }
 0x196   : > { %475 = vperm.xlu1 %696, %v457_v49  }
 0x19a   : > { %480 = vperm.xlu1 %696, %v458_v52  }
 0x209   : > { %v464_v53 = vpop.permute.xlu0 %463 }
 0x20a   : > { %v471_v55 = vmul.f32 %v464_v53, %v789_v6 }
 0x20d   : > { %v469_v54 = vpop.permute.xlu1 %468 }
 0x20e   : > { %v472_v58 = vmul.f32 %v469_v54, %v794_v9 }
 0x211   : > { %v476_v56 = vpop.permute.xlu1 %475 }
 0x212   : > { %v483_v57 = vadd.f32 %v476_v56, %v471_v55 }
 0x214   : > { %vm485_vm3 = vcmp.gt.f32.partialorder %v483_v57, 0.0  ;;  %v487_v59 = vmul.f32 0.2, %v483_v57 }
 0x215   : > { %v481_v60 = vpop.permute.xlu1 %480 }
 0x216   : > { %v489_v61 = vsel %vm485_vm3, %v483_v57, %v487_v59  ;;  %v484_v62 = vadd.f32 %v481_v60, %v472_v58 }
 0x217   : > { %491 = vst [vmem:[%s303_s10] sm:$0xff] %v489_v61 }
 0x218   : > { %vm486_vm4 = vcmp.gt.f32.partialorder %v484_v62, 0.0  ;;  %v488_v63 = vmul.f32 0.2, %v484_v62 }
 0x21a   : > { %v490_v0 = vsel %vm486_vm4, %v484_v62, %v488_v63 }
 0x21b   : > { %492 = vst [vmem:[%s303_s10 + $0x8] sm:$0xff] %v490_v0 }
 0x21c PF: > { %s14_s17 = sadd.s32 1, %s728_s17   ;;  %s835_s15 = smov %s724_s16 }
 0x21d   : > { %p11_p5 = scmp.ge.s32.totalorder %s14_s17, 4   ;;  %s836_s16 = smov %s838_s18 }
 0x21f   :  { %13 = sbr.rel (!%p11_p5) target bundleno = 2 (0x2), region = 84 }

</bundles_post_ra>
